<compile_context>
chip_gen: v7x
topology: tpu7x:2x2x1
jax: 0.10.0
libtpu: 0.0.40
codegen_flags: <defaults>
</compile_context>

<pallas_src>
import jax
import jax.numpy as jnp
from jax import lax
from jax.experimental import pallas as pl
from jax.experimental.pallas import tpu as pltpu


def _round_up(n, m):
    return -(-n // m) * m


def _pick_tile(b_pad, tb_max):
    """Largest multiple-of-128 divisor of b_pad that fits tb_max; prefer >= 2 grid
    steps (v7x megacore) when that doesn't shrink the tile below half the best."""
    n = b_pad // 128
    cands = [d for d in range(1, n + 1) if n % d == 0 and 128 * d <= tb_max]
    best = max(cands)
    two_step = [d for d in cands if n // d >= 2]
    if two_step and 2 * max(two_step) >= best:
        best = max(two_step)
    return 128 * best


def _pick_chunk(tb, chunk_max=512):
    """Largest multiple-of-128 divisor of tb that is <= chunk_max."""
    n = tb // 128
    best = max(d for d in range(1, n + 1) if n % d == 0 and 128 * d <= chunk_max)
    return 128 * best


def _make_mlp_kernel(tb, tc):
    n_chunks = tb // tc

    def mlp_kernel(x_ref, w0_ref, b0_ref, w1_ref, b1_ref, w2_ref, b2_ref, o_ref):
        # Grid-invariant VMEM residents: read once per tile, reused by all chunks.
        w0 = w0_ref[...]; b0 = b0_ref[...]      # (10, 20), (10, 1)
        w1 = w1_ref[...]; b1 = b1_ref[...]      # (10, 10), (10, 1)
        w2 = w2_ref[...]; b2 = b2_ref[...]      # (2, 10),  (2, 1)

        def chunk_body(c, carry):
            start = pl.multiple_of(c * tc, tc)
            xc = x_ref[pl.ds(start, tc), :]                   # (tc, 20), natural layout

            # dense0 + relu: contract over x's last axis -> feature-major (10, tc)
            h0 = lax.dot_general(w0, xc, (((1,), (1,)), ((), ())),
                                 preferred_element_type=jnp.float32) + b0
            h0 = jnp.maximum(h0, 0.0)

            # dropout(p=0.5): identity in eval mode.
            # TODO(synk): training-mode dropout (pltpu.prng_seed + prng_random_bits
            #             Bernoulli mask with 1/(1-p) scaling) not implemented.

            # dense1 + relu (feature-major: batch stays on the 128-wide lane axis)
            h1 = jnp.dot(w1, h0, preferred_element_type=jnp.float32) + b1
            h1 = jnp.maximum(h1, 0.0)                          # (10, tc)

            # output layer + 2-class softmax in sign-stable sigmoid form:
            # no exp overflow, no cross-lane reduce; exp/reciprocal hit the EUP slot.
            logits = jnp.dot(w2, h1, preferred_element_type=jnp.float32) + b2
            dlt = logits[0:1, :] - logits[1:2, :]              # l0 - l1, (1, tc)
            e = jnp.exp(-jnp.abs(dlt))                         # in (0, 1]
            s = e * pl.reciprocal(1.0 + e, approx=False)       # sigmoid(-|dlt|)
            p0 = jnp.where(dlt >= 0, 1.0 - s, s)               # sigmoid(dlt)
            p1 = 1.0 - p0

            # Direct sublane stores (no concat/relayout), lane-dense along batch.
            o_ref[0:1, pl.ds(start, tc)] = p0
            o_ref[1:2, pl.ds(start, tc)] = p1
            return carry

        lax.fori_loop(0, n_chunks, chunk_body, 0, unroll=(n_chunks <= 4))

    return mlp_kernel


def my_module_forward(x, params, *, tb_max=8192):
    """x: (B, 20) float32. params: PyTorch-layout weights W[out, in], b[out, 1].
    Returns softmax probabilities of shape (B, 2)."""
    B = x.shape[0]
    w0, b0 = params["w0"], params["b0"]     # (10, 20), (10, 1)
    w1, b1 = params["w1"], params["b1"]     # (10, 10), (10, 1)
    w2, b2 = params["w2"], params["b2"]     # (2, 10),  (2, 1)

    # Pad batch only to a multiple of 128; tile is a divisor of the padded batch.
    b_pad = _round_up(max(B, 1), 128)
    x_p = x if b_pad == B else jnp.pad(x, ((0, b_pad - B), (0, 0)))
    tb = _pick_tile(b_pad, tb_max)
    tc = _pick_chunk(tb)

    resident = pl.BlockSpec(memory_space=pltpu.MemorySpace.VMEM)  # grid-invariant

    out_t = pl.pallas_call(
        _make_mlp_kernel(tb, tc),
        out_shape=jax.ShapeDtypeStruct((2, b_pad), jnp.float32),
        grid=(b_pad // tb,),
        in_specs=[
            pl.BlockSpec((tb, 20), lambda i: (i, 0)),   # x batch tile, natural layout
            resident, resident,                          # W0, b0 (VMEM-resident)
            resident, resident,                          # W1, b1
            resident, resident,                          # W2, b2
        ],
        out_specs=pl.BlockSpec((2, tb), lambda i: (0, i)),   # lane-dense output
        compiler_params=pltpu.CompilerParams(
            dimension_semantics=("parallel",)),
    )(x_p, w0, b0, w1, b1, w2, b2)

    # Tiny (2, B) -> (B, 2) relayout: 8 B/row vs the 80 B/row input read.
    return out_t[:, :B].T


def init_params(key, num_units=10):
    """Deterministic init mirroring nn.Linear. Weights in PyTorch [out, in] layout
    (kernel computes W @ x^T in feature-major space); biases are [out, 1]."""
    k0, k1, k2 = jax.random.split(key, 3)

    def linear(k, fan_in, fan_out):
        kw, kb = jax.random.split(k)
        bound = 1.0 / float(fan_in) ** 0.5
        w = jax.random.uniform(kw, (fan_out, fan_in), jnp.float32, -bound, bound)
        b = jax.random.uniform(kb, (fan_out, 1), jnp.float32, -bound, bound)
        return w, b

    w0, b0 = linear(k0, 20, num_units)       # dense0: Linear(20, num_units)
    w1, b1 = linear(k1, num_units, 10)       # dense1: Linear(num_units, 10)
    w2, b2 = linear(k2, 10, 2)               # output: Linear(10, 2)
    return {"w0": w0, "b0": b0, "w1": w1, "b1": b1, "w2": w2, "b2": b2}


def reference_forward(x, params):
    """Pure-JAX reference (batch-major), matches PyTorch eval-mode semantics."""
    w0, b0 = params["w0"], params["b0"]
    w1, b1 = params["w1"], params["b1"]
    w2, b2 = params["w2"], params["b2"]
    h0 = jnp.maximum(x @ w0.T + b0[:, 0], 0.0)
    h1 = jnp.maximum(h0 @ w1.T + b1[:, 0], 0.0)
    logits = h1 @ w2.T + b2[:, 0]
    return jax.nn.softmax(logits, axis=-1)


if __name__ == "__main__":
    key = jax.random.PRNGKey(0)
    kx, kp = jax.random.split(key)

    B = 8
    x = jax.random.normal(kx, (B, 20), dtype=jnp.float32)
    params = init_params(kp, num_units=10)

    out = jax.block_until_ready(my_module_forward(x, params))

    # sanity: shape, softmax rows sum to 1, matches pure-JAX reference
    assert out.shape == (B, 2)
    assert jnp.allclose(jnp.sum(out, axis=-1), 1.0, atol=1e-5)
    ref = reference_forward(x, params)
    assert jnp.allclose(out, ref, atol=1e-4, rtol=1e-4)

    print("KERNEL_OK")
</pallas_src>

<mosaic_0001>
module attributes {stable_mosaic.version = 11 : i64} {
  func.func @mlp_kernel(%arg0: i32, %arg1: memref<128x20xf32, #tpu.memory_space<vmem>>, %arg2: memref<10x20xf32, #tpu.memory_space<vmem>>, %arg3: memref<10x1xf32, #tpu.memory_space<vmem>>, %arg4: memref<10x10xf32, #tpu.memory_space<vmem>>, %arg5: memref<10x1xf32, #tpu.memory_space<vmem>>, %arg6: memref<2x10xf32, #tpu.memory_space<vmem>>, %arg7: memref<2x1xf32, #tpu.memory_space<vmem>>, %arg8: memref<2x128xf32, #tpu.memory_space<vmem>>) attributes {dimension_semantics = [#tpu.dimension_semantics<parallel>], iteration_bounds = array<i64: 1>, scalar_prefetch = 0 : i64, scratch_operands = 0 : i64, tpu.core_type = #tpu.core_type<tc>, window_params = [{transform_indices = @transform_0, window_bounds = array<i64: 128, 20>}, {pipeline_mode = #tpu.pipeline_mode<synchronous>, transform_indices = @transform_1, window_bounds = array<i64: 10, 20>}, {pipeline_mode = #tpu.pipeline_mode<synchronous>, transform_indices = @transform_2, window_bounds = array<i64: 10, 1>}, {pipeline_mode = #tpu.pipeline_mode<synchronous>, transform_indices = @transform_3, window_bounds = array<i64: 10, 10>}, {pipeline_mode = #tpu.pipeline_mode<synchronous>, transform_indices = @transform_4, window_bounds = array<i64: 10, 1>}, {pipeline_mode = #tpu.pipeline_mode<synchronous>, transform_indices = @transform_5, window_bounds = array<i64: 2, 10>}, {pipeline_mode = #tpu.pipeline_mode<synchronous>, transform_indices = @transform_6, window_bounds = array<i64: 2, 1>}, {transform_indices = @transform_7, window_bounds = array<i64: 2, 128>}]} {
    %c0 = arith.constant 0 : index
    %c0_0 = arith.constant 0 : index
    %0 = vector.load %arg2[%c0, %c0_0] : memref<10x20xf32, #tpu.memory_space<vmem>>, vector<10x20xf32>
    %c0_1 = arith.constant 0 : index
    %c0_2 = arith.constant 0 : index
    %1 = vector.load %arg3[%c0_1, %c0_2] : memref<10x1xf32, #tpu.memory_space<vmem>>, vector<10x1xf32>
    %c0_3 = arith.constant 0 : index
    %c0_4 = arith.constant 0 : index
    %2 = vector.load %arg4[%c0_3, %c0_4] : memref<10x10xf32, #tpu.memory_space<vmem>>, vector<10x10xf32>
    %c0_5 = arith.constant 0 : index
    %c0_6 = arith.constant 0 : index
    %3 = vector.load %arg5[%c0_5, %c0_6] : memref<10x1xf32, #tpu.memory_space<vmem>>, vector<10x1xf32>
    %c0_7 = arith.constant 0 : index
    %c0_8 = arith.constant 0 : index
    %4 = vector.load %arg6[%c0_7, %c0_8] : memref<2x10xf32, #tpu.memory_space<vmem>>, vector<2x10xf32>
    %c0_9 = arith.constant 0 : index
    %c0_10 = arith.constant 0 : index
    %5 = vector.load %arg7[%c0_9, %c0_10] : memref<2x1xf32, #tpu.memory_space<vmem>>, vector<2x1xf32>
    %c0_i32 = arith.constant 0 : i32
    %c128_i32 = arith.constant 128 : i32
    %6 = arith.muli %c0_i32, %c128_i32 : i32
    %7 = tpu.assume_multiple %6, 128 : i32
    %8 = arith.index_cast %7 : i32 to index
    %c0_11 = arith.constant 0 : index
    %9 = vector.load %arg1[%8, %c0_11] : memref<128x20xf32, #tpu.memory_space<vmem>>, vector<128x20xf32>
    %cst = arith.constant dense<0.000000e+00> : vector<10x128xf32>
    %10 = tpu.matmul %0, %9, %cst {dimension_numbers = #tpu.dot_dimension_numbers<[1], [1], [0], [0], [0, 0, 1, 0], [], []>} : vector<10x20xf32>, vector<128x20xf32>, vector<10x128xf32> -> vector<10x128xf32>
    %11 = vector.broadcast %1 : vector<10x1xf32> to vector<10x128xf32>
    %12 = arith.addf %10, %11 : vector<10x128xf32>
    %cst_12 = arith.constant 0.000000e+00 : f32
    %13 = vector.broadcast %cst_12 : f32 to vector<10x128xf32>
    %14 = arith.maximumf %12, %13 : vector<10x128xf32>
    %cst_13 = arith.constant dense<0.000000e+00> : vector<10x128xf32>
    %15 = tpu.matmul %2, %14, %cst_13 {dimension_numbers = #tpu.dot_dimension_numbers<[1], [0], [0], [1], [0, 0, 1, 1], [], []>} : vector<10x10xf32>, vector<10x128xf32>, vector<10x128xf32> -> vector<10x128xf32>
    %16 = vector.broadcast %3 : vector<10x1xf32> to vector<10x128xf32>
    %17 = arith.addf %15, %16 : vector<10x128xf32>
    %cst_14 = arith.constant 0.000000e+00 : f32
    %18 = vector.broadcast %cst_14 : f32 to vector<10x128xf32>
    %19 = arith.maximumf %17, %18 : vector<10x128xf32>
    %cst_15 = arith.constant dense<0.000000e+00> : vector<2x128xf32>
    %20 = tpu.matmul %4, %19, %cst_15 {dimension_numbers = #tpu.dot_dimension_numbers<[1], [0], [0], [1], [0, 0, 1, 1], [], []>} : vector<2x10xf32>, vector<10x128xf32>, vector<2x128xf32> -> vector<2x128xf32>
    %21 = vector.broadcast %5 : vector<2x1xf32> to vector<2x128xf32>
    %22 = arith.addf %20, %21 : vector<2x128xf32>
    %23 = vector.extract_strided_slice %22 {offsets = [0, 0], sizes = [1, 128], strides = [1, 1]} : vector<2x128xf32> to vector<1x128xf32>
    %24 = vector.extract_strided_slice %22 {offsets = [1, 0], sizes = [1, 128], strides = [1, 1]} : vector<2x128xf32> to vector<1x128xf32>
    %25 = arith.subf %23, %24 : vector<1x128xf32>
    %26 = math.absf %25 : vector<1x128xf32>
    %cst_16 = arith.constant 0.000000e+00 : f32
    %27 = vector.broadcast %cst_16 : f32 to vector<1x128xf32>
    %28 = arith.subf %27, %26 : vector<1x128xf32>
    %29 = math.exp %28 : vector<1x128xf32>
    %cst_17 = arith.constant 1.000000e+00 : f32
    %30 = vector.broadcast %cst_17 : f32 to vector<1x128xf32>
    %31 = arith.addf %30, %29 : vector<1x128xf32>
    %32 = tpu.reciprocal %31 : vector<1x128xf32> -> vector<1x128xf32>
    %33 = arith.mulf %29, %32 : vector<1x128xf32>
    %cst_18 = arith.constant 0.000000e+00 : f32
    %34 = vector.broadcast %cst_18 : f32 to vector<1x128xf32>
    %35 = arith.cmpf oge, %25, %34 : vector<1x128xf32>
    %cst_19 = arith.constant 1.000000e+00 : f32
    %36 = vector.broadcast %cst_19 : f32 to vector<1x128xf32>
    %37 = arith.subf %36, %33 : vector<1x128xf32>
    %38 = arith.select %35, %37, %33 : vector<1x128xi1>, vector<1x128xf32>
    %cst_20 = arith.constant 1.000000e+00 : f32
    %39 = vector.broadcast %cst_20 : f32 to vector<1x128xf32>
    %40 = arith.subf %39, %38 : vector<1x128xf32>
    %c0_21 = arith.constant 0 : index
    %41 = arith.index_cast %7 : i32 to index
    %42 = vector.load %arg8[%c0_21, %41] : memref<2x128xf32, #tpu.memory_space<vmem>>, vector<1x128xf32>
    tpu.vector_store %arg8[%c0_21, %41], %38 {strides = array<i32>} : memref<2x128xf32, #tpu.memory_space<vmem>>, vector<1x128xf32>,
    %c1 = arith.constant 1 : index
    %43 = arith.index_cast %7 : i32 to index
    %44 = vector.load %arg8[%c1, %43] : memref<2x128xf32, #tpu.memory_space<vmem>>, vector<1x128xf32>
    tpu.vector_store %arg8[%c1, %43], %40 {strides = array<i32>} : memref<2x128xf32, #tpu.memory_space<vmem>>, vector<1x128xf32>,
    %c1_i32 = arith.constant 1 : i32
    return
  }
  func.func @transform_0(%arg0: i32) -> (i32, i32) {
    %c0_i32 = arith.constant 0 : i32
    %c0_i32_0 = arith.constant 0 : i32
    return %arg0, %c0_i32 : i32, i32
  }
  func.func @transform_1(%arg0: i32) -> (i32, i32) {
    %c0_i32 = arith.constant 0 : i32
    %c0_i32_0 = arith.constant 0 : i32
    %c0_i32_1 = arith.constant 0 : i32
    return %c0_i32, %c0_i32_0 : i32, i32
  }
  func.func @transform_2(%arg0: i32) -> (i32, i32) {
    %c0_i32 = arith.constant 0 : i32
    %c0_i32_0 = arith.constant 0 : i32
    %c0_i32_1 = arith.constant 0 : i32
    return %c0_i32, %c0_i32_0 : i32, i32
  }
  func.func @transform_3(%arg0: i32) -> (i32, i32) {
    %c0_i32 = arith.constant 0 : i32
    %c0_i32_0 = arith.constant 0 : i32
    %c0_i32_1 = arith.constant 0 : i32
    return %c0_i32, %c0_i32_0 : i32, i32
  }
  func.func @transform_4(%arg0: i32) -> (i32, i32) {
    %c0_i32 = arith.constant 0 : i32
    %c0_i32_0 = arith.constant 0 : i32
    %c0_i32_1 = arith.constant 0 : i32
    return %c0_i32, %c0_i32_0 : i32, i32
  }
  func.func @transform_5(%arg0: i32) -> (i32, i32) {
    %c0_i32 = arith.constant 0 : i32
    %c0_i32_0 = arith.constant 0 : i32
    %c0_i32_1 = arith.constant 0 : i32
    return %c0_i32, %c0_i32_0 : i32, i32
  }
  func.func @transform_6(%arg0: i32) -> (i32, i32) {
    %c0_i32 = arith.constant 0 : i32
    %c0_i32_0 = arith.constant 0 : i32
    %c0_i32_1 = arith.constant 0 : i32
    return %c0_i32, %c0_i32_0 : i32, i32
  }
  func.func @transform_7(%arg0: i32) -> (i32, i32) {
    %c0_i32 = arith.constant 0 : i32
    %c0_i32_0 = arith.constant 0 : i32
    return %c0_i32, %arg0 : i32, i32
  }
}

</mosaic_0001>

<bundles_post_ra>
// kernel: tpu_custom_call.1
= control target key start
LH: loop header
LB: loop body
LE: loop exit
PB: predicated region body
PF: predicated region fallthrough
CT: control target
= control target key end

     0   :  { %vm63_vm0 = vcmask 162816   ;;  %v596_v6 = vmov 0   ;;  %s785_s0 = inlined_call_operand.vmem [shape: f32[128,20], index: 0, kind: input, shape index: {}]   ;;  %s786_s1 = inlined_call_operand.vmem [shape: f32[10,20], index: 1, kind: input, shape index: {}]   ;;  %s787_s2 = inlined_call_operand.vmem [shape: f32[10,1], index: 2, kind: input, shape index: {}]   ;;  %s788_s3 = inlined_call_operand.vmem [shape: f32[10,10], index: 3, kind: input, shape index: {}]   ;;  %s789_s4 = inlined_call_operand.vmem [shape: f32[10,1], index: 4, kind: input, shape index: {}]   ;;  %s790_s5 = inlined_call_operand.vmem [shape: f32[2,10], index: 5, kind: input, shape index: {}]   ;;  %s791_s6 = inlined_call_operand.vmem [shape: f32[2,1], index: 6, kind: input, shape index: {}]   ;;  %s792_s7 = inlined_call_operand.hbm [shape: f32[2,128], index: 7, kind: output, shape index: {}]  }
   0x1   :  { %v37_v0 = vld [vmem:[%s785_s0] sm:$0xff]  ;;  %v38_v1 = vld [vmem:[%s785_s0 + $0x8] sm:$0xff]  ;;  %v39_v2 = vld [vmem:[%s785_s0 + $0x10] sm:$0xff]  ;;  %566 = vset.pattern.permute.xlu0 %v596_v6  ;;  %567 = vset.pattern.permute.xlu1 %v596_v6 }
   0x2   :  { %v502_v3 = vpack.c.bf16 %v38_v1, %v37_v0  ;;  %vm653_vm1 = vmpackc.low %vm63_vm0, %vm63_vm0  ;;  %v40_v5 = vld [vmem:[%s785_s0 + $0x18] sm:$0xff]  ;;  %v27_v8 = vld [vmem:[%s786_s1] sm:$0xff] }
   0x3   :  { %v508_v7 = vpack.c.bf16 %v40_v5, %v39_v2  ;;  %v41_v9 = vld [vmem:[%s785_s0 + $0x20] sm:$0xff]  ;;  %v42_v10 = vld [vmem:[%s785_s0 + $0x28] sm:$0xff]  ;;  %485 = vmatprep.mubr.msk.f32.mxu0 %vm63_vm0, %v27_v8 }
   0x4   :  { %504 = vmatprep.subr.msk.bf16.mxu0 %vm653_vm1, %v502_v3  ;;  %v29_v11 = vld [vmem:[%s787_s2] sm:$0xff] }
   0x5   :  { %507 = vmatpush3.bf16.xpose.msk.msra.mxu0 %vm653_vm1, %v502_v3  ;;  %55 = vperm.xlu0 %566, %v29_v11  }
   0x6   :  { %510 = vmatprep.subr.msk.bf16.mxu0 %vm653_vm1, %v508_v7 }
   0x7   :  { %12 = vsyncpa [#allocation3], 0  ;;  %v30_v12 = vld [vmem:[%s787_s2 + $0x8] sm:$0x3]  ;;  %v514_v13 = vpack.c.bf16 %v42_v10, %v41_v9  ;;  %v36_v14 = vld [vmem:[%s791_s6] sm:$0x3] }
   0x8   :  { %v43_v15 = vld [vmem:[%s785_s0 + $0x30] sm:$0xff]  ;;  %v44_v16 = vld [vmem:[%s785_s0 + $0x38] sm:$0xff]  ;;  %v45_v18 = vld [vmem:[%s785_s0 + $0x40] sm:$0xff]  ;;  %vm205_vm2 = vcmask 80896   ;;  %vm212_vm3 = vcmask 1041408   ;;  %vm597_vm4 = vmmov 1  }
   0x9   :  { %60 = vperm.xlu0 %566, %v30_v12   ;;  %v520_v17 = vpack.c.bf16 %v44_v16, %v43_v15  ;;  %v46_v19 = vld [vmem:[%s785_s0 + $0x48] sm:$0xff]  ;;  %v47_v21 = vld [vmem:[%s785_s0 + $0x50] sm:$0xff]  ;;  %v48_v22 = vld [vmem:[%s785_s0 + $0x58] sm:$0xff]  ;;  %v598_v45 = vmov 0.0|0.0   ;;  %vm599_vm6 = vmmov 0   ;;  %v600_v46 = vmov 0.0  }
   0xa   :  { %v526_v20 = vpack.c.bf16 %v46_v19, %v45_v18  ;;  %v532_v23 = vpack.c.bf16 %v48_v22, %v47_v21  ;;  %v49_v24 = vld [vmem:[%s785_s0 + $0x60] sm:$0xff]  ;;  %v50_v25 = vld [vmem:[%s785_s0 + $0x68] sm:$0xff]  ;;  %v51_v27 = vld [vmem:[%s785_s0 + $0x70] sm:$0xff]  ;;  %s601_s24 = smov [#allocation2]  }
   0xb   :  { %v538_v26 = vpack.c.bf16 %v50_v25, %v49_v24  ;;  %v52_v28 = vld [vmem:[%s785_s0 + $0x78] sm:$0xff]  ;;  %v28_v30 = vld [vmem:[%s786_s1 + $0x8] sm:$0x3]  ;;  %v31_v31 = vld [vmem:[%s788_s3] sm:$0xff] }
   0xc   :  { %v544_v29 = vpack.c.bf16 %v52_v28, %v51_v27  ;;  %492 = vmatprep.mubr.msk.f32.mxu1 %vm205_vm2, %v31_v31  ;;  %v33_v32 = vld [vmem:[%s789_s4] sm:$0xff]  ;;  %v34_v33 = vld [vmem:[%s789_s4 + $0x8] sm:$0x3]  ;;  %vm755_vm5 = vmpackc.low %vm212_vm3, %vm597_vm4 }
   0xd   :  { %513 = vmatpush3.bf16.xpose.msk.msra.mxu0 %vm653_vm1, %v508_v7  ;;  %295 = vperm.xlu0 %566, %v36_v14   ;;  %v32_v44 = vld [vmem:[%s788_s3 + $0x8] sm:$0x3]  ;;  %v35_v56 = vld [vmem:[%s790_s5] sm:$0x3]  ;;  %s397_s5 = sshll.u32 %s601_s24, 4  ;;  %s398_s5 = int_to_ptr.vmem [resolvable:$true] %s397_s5 }
   0xe   :  { %516 = vmatprep.subr.msk.bf16.mxu0 %vm653_vm1, %v514_v13  ;;  %197 = vperm.xlu1 %567, %v33_v32   ;;  %s572_s2 = scalar_lea.vmem %s398_s5, 32  ;;  %p577_p1 = scmp.lt.s32.totalorder %s398_s5, %s398_s5 }
   0xf   :  { %p573_p0 = scmp.ne.s32.totalorder %s398_s5, %s572_s2  ;;  %p578_p2 = scmp.lt.s32.totalorder %s572_s2, %s572_s2 }
  0x11   :  { %p579_p3 = por %p578_p2, %p577_p1 }
  0x12   :  { %202 = vperm.xlu1 %567, %v34_v33  }
  0x13   :  { %p580_p4 = pnand %p579_p3, %p573_p0 }
  0x15   :  { %519 = vmatpush3.bf16.xpose.msk.msra.mxu0 %vm653_vm1, %v514_v13 }
  0x16   :  { %522 = vmatprep.subr.msk.bf16.mxu0 %vm653_vm1, %v520_v17 }
  0x1d   :  { %525 = vmatpush3.bf16.xpose.msk.msra.mxu0 %vm653_vm1, %v520_v17 }
  0x1e   :  { %528 = vmatprep.subr.msk.bf16.mxu0 %vm653_vm1, %v526_v20 }
  0x25   :  { %531 = vmatpush3.bf16.xpose.msk.msra.mxu0 %vm653_vm1, %v526_v20 }
  0x26   :  { %534 = vmatprep.subr.msk.bf16.mxu0 %vm653_vm1, %v532_v23 }
  0x2d   :  { %537 = vmatpush3.bf16.xpose.msk.msra.mxu0 %vm653_vm1, %v532_v23 }
  0x2e   :  { %540 = vmatprep.subr.msk.bf16.mxu0 %vm653_vm1, %v538_v26 }
  0x35   :  { %543 = vmatpush3.bf16.xpose.msk.msra.mxu0 %vm653_vm1, %v538_v26 }
  0x36   :  { %546 = vmatprep.subr.msk.bf16.mxu0 %vm653_vm1, %v544_v29 }
  0x3d   :  { %549 = vmatpush3.bf16.xpose.msk.msra.mxu0 %vm653_vm1, %v544_v29 }
  0x44   :  { %486 = vmatmul.mubr.msk.f32.vlgmr.msra.gmra.mrb[0].mxu0 %vm63_vm0, %v28_v30 }
  0x84   :  { %v56_v34 = vpop.permute.xlu0 %55 }
  0x88   :  { %v61_v35 = vpop.permute.xlu0 %60 }
  0x8c   :  { %v296_v57 = vpop.permute.xlu0 %295 }
  0x8d   :  { %v198_v47 = vpop.permute.xlu1 %197 }
  0x91   :  { %v203_v48 = vpop.permute.xlu1 %202 }
 0x117   :  { %v487_v36 = vpop.f32.mrb[0].mxu0 }
 0x118   :  { %v190_v37 = vadd.f32 %v487_v36, %v61_v35  ;;  %v184_v38 = vpop.f32.mrb[1].mxu0 }
 0x119   :  { %v185_v39 = vadd.f32 %v184_v38, %v56_v34 }
 0x11a   :  { %v194_v40 = vmax.f32 %v190_v37, 0.0 }
 0x11b   :  { %v193_v41 = vmax.f32 %v185_v39, 0.0 }
 0x11d   :  { %v550_v43 = vpack.c.bf16 %v194_v40, %v193_v41 }
 0x11f   :  { %552 = vmatprep.subr.msk.bf16.mxu1 %vm755_vm5, %v550_v43 }
 0x120   :  { %555 = vmatpush3.bf16.msk.msra.mxu1 %vm755_vm5, %v550_v43 }
 0x121   :  { %556 = vmatprep.subr.bf16.mxu1 %v598_v45 }
 0x123   :  { %493 = vmatmul.mubr.msk.f32.vlgmr.msra.gmra.mrb[0].mxu1 %vm205_vm2, %v32_v44 }
 0x124   :  { %499 = vmatprep.mubr.msk.f32.mxu1 %vm599_vm6, %v600_v46 }
 0x1f6   :  { %v494_v49 = vpop.f32.mrb[0].mxu1 }
 0x1f7   :  { %v288_v50 = vadd.f32 %v494_v49, %v203_v48  ;;  %v282_v51 = vpop.f32.mrb[1].mxu1 }
 0x1f8   :  { %v283_v52 = vadd.f32 %v282_v51, %v198_v47 }
 0x1f9   :  { %v292_v53 = vmax.f32 %v288_v50, 0.0 }
 0x1fa   :  { %v291_v54 = vmax.f32 %v283_v52, 0.0 }
 0x1fc   :  { %v557_v55 = vpack.c.bf16 %v292_v53, %v291_v54 }
 0x1fe   :  { %559 = vmatpush3.bf16.msk.msra.mxu1 %vm755_vm5, %v557_v55 }
 0x201   :  { %500 = vmatmul.mubr.msk.f32.vlgmr.msra.gmra.mrb[2].mxu1 %vm205_vm2, %v35_v56 }
 0x2d4   :  { %v370_v58 = vpop.f32.mrb[2].mxu1 }
 0x2d5   :  { %v371_v59 = vadd.f32 %v370_v58, %v296_v57  ;;  %v501_v60 = vpop.f32.mrb[3].mxu1 }
 0x2d7   :  { %v375_v61 = vrot.slane %v371_v59, 1 }
 0x2d9   :  { %v377_v62 = vsub.f32 %v371_v59, %v375_v61 }
 0x2db   :  { %v378_v63 = vand.u32 2147483647, %v377_v62  ;;  %vm385_vm7 = vcmp.ge.f32.partialorder %v377_v62, 0.0 }
 0x2dd   :  { %v379_v0 = vsub.f32 0.0, %v378_v63 }
 0x2df   :  { %v380_v1 = vmul.f32 1.442695, %v379_v0 }
 0x2e1   :  { %568 = vpow2.f32 %v380_v1 }
 0x2eb   :  { %v569_v2 = vpop.eup %568 }
 0x2ec   :  { %v382_v3 = vadd.f32 1.0, %v569_v2 }
 0x2ee   :  { %570 = vrcp.f32 %v382_v3 }
 0x2f8   :  { %v571_v4 = vpop.eup %570 }
 0x2f9   :  { %v384_v5 = vmul.f32 %v571_v4, %v569_v2 }
 0x2fb   :  { %v386_v6 = vsub.f32 1.0, %v384_v5 }
 0x2fd   :  { %v387_v7 = vsel %vm385_vm7, %v386_v6, %v384_v5 }
 0x2fe   :  { %v388_v8 = vsub.f32 1.0, %v387_v7  ;;  %389 = vst [vmem:[#allocation2] sm:$0x1] %v387_v7 }
 0x300   :  { %390 = vst [vmem:[#allocation2 + $0x1] sm:$0x1] %v388_v8 }
 0x301   :  { %583 = shalt.err (!%p580_p4)
}
 0x302   :  { %s584_s26 = scalar_lea.hbm %s792_s7, 32 }
 0x303   :  { %p585_p5 = scmp.ne.s32.totalorder %s792_s7, %s584_s26  ;;  %p588_p6 = scmp.lt.u32.totalorder %s584_s26, %s792_s7 }
 0x305   :  { %p590_p7 = pnand %p588_p6, %p585_p5 }
 0x307   :  { %593 = shalt.err (!%p590_p7)
}
 0x308   :  { %400 = dma.vmem_to_hbm [thread:$0]  %s398_s5, 32, %s792_s7, [#allocation3]  }
 0x309   :  { %594 = dma.done.wait [#allocation3], 32  }
 0x30a   :  { %595 = vsyncadd [#allocation3], 4294967264 }
 0x30b   :  { %404 = vsyncpa [#allocation3], 1 }

</bundles_post_ra>
